<compile_context>
chip_gen: v7x
topology: tpu7x:2x2x1
jax: 0.10.0
libtpu: 0.0.40
codegen_flags: <defaults>
</compile_context>

<pallas_src>
import functools
import math

import jax
import jax.numpy as jnp
from jax.experimental import pallas as pl
from jax.experimental.pallas import tpu as pltpu


def _head_kernel(x_ref, w_ref, b_ref, cls_ref, reg_ref, dir_ref, *, c_cls, c_reg):
    # x_ref: (Cin, tn) pixel tile (channels x pixels); w_ref: (Ctot, Cin);
    # b_ref: (Ctot, 1).  One fused matmul for all three heads, then static
    # row-slice writes to the three lane-dense (Cout_i, tn) output tiles.
    acc = (jnp.dot(w_ref[...], x_ref[...], preferred_element_type=jnp.float32)
           + b_ref[...])
    cls_ref[...] = acc[:c_cls].astype(cls_ref.dtype)
    reg_ref[...] = acc[c_cls:c_cls + c_reg].astype(reg_ref.dtype)
    dir_ref[...] = acc[c_cls + c_reg:].astype(dir_ref.dtype)


def _round_up(x, m):
    return ((x + m - 1) // m) * m


def _pick_tile_and_vmem():
    """Per-generation pixel tile and scoped-VMEM limit for this HBM-bound kernel."""
    try:
        vmem_cap = pltpu.get_tpu_info().vmem_capacity_bytes
    except Exception:
        vmem_cap = 64 << 20  # conservative fallback (v7x-sized)
    if vmem_cap >= (96 << 20):
        # v5e / v6e: 128 MiB physical VMEM -> big tiles, 48 MiB scoped limit
        # (x block (Cin=384, 8192) f32 = 12 MiB, double-buffered = 24 MiB).
        return 8192, 48 * 1024 * 1024
    # v7x: 64 MiB VMEM per TensorCore -> 4096-pixel tiles, 32 MiB limit.
    return 4096, 32 * 1024 * 1024


def head_forward(x_nchw, params, *, tn=None):
    """x_nchw: (B, Cin, H, W) float32.  Returns three NCHW tensors (cls, reg, dir)."""
    B, Cin, H, W = x_nchw.shape
    w_cls, b_cls, w_reg, b_reg, w_dir, b_dir = params
    Ccls, Creg, Cdir = w_cls.shape[0], w_reg.shape[0], w_dir.shape[0]
    Ctot = Ccls + Creg + Cdir

    # Fuse the three heads' weights/biases (tiny, one-time) for a single dot.
    w_all = jnp.concatenate([w_cls, w_reg, w_dir], axis=0)   # (Ctot, Cin)
    b_all = jnp.concatenate([b_cls, b_reg, b_dir], axis=0)   # (Ctot, 1)

    HW = H * W
    # Free reshape (NCHW is contiguous over the last two dims): no data movement.
    x3 = x_nchw.reshape(B, Cin, HW)

    tn_auto, vmem_limit = _pick_tile_and_vmem()
    if tn is None:
        tn = tn_auto
    # Clamp so tiny test shapes don't over-pad; keep a multiple of 128 lanes.
    tn = min(tn, _round_up(HW, 128))
    n_blocks = pl.cdiv(HW, tn)   # boundary block padded/masked by Pallas

    # Grid: (n_blocks, B) — the big pixel-block axis is OUTER so multi-TC chips
    # (v7x megacore) shard it even when B == 1.
    x_spec = pl.BlockSpec((None, Cin, tn), lambda n, b: (b, 0, n))
    w_spec = pl.BlockSpec((Ctot, Cin), lambda n, b: (0, 0))
    b_spec = pl.BlockSpec((Ctot, 1), lambda n, b: (0, 0))

    def out_spec(co):
        return pl.BlockSpec((None, co, tn), lambda n, b: (b, 0, n))

    # Advisory cost hint for XLA scheduling around this mem-bound call.
    flops = 2 * B * HW * Cin * Ctot
    bytes_accessed = 4 * (B * Cin * HW            # activations read
                          + B * HW * Ctot         # outputs written
                          + Ctot * Cin + Ctot)    # weights + biases
    cost = pl.CostEstimate(flops=flops, transcendentals=0,
                           bytes_accessed=bytes_accessed)

    kernel = functools.partial(_head_kernel, c_cls=Ccls, c_reg=Creg)

    cls3, reg3, dir3 = pl.pallas_call(
        kernel,
        out_shape=(
            jax.ShapeDtypeStruct((B, Ccls, HW), jnp.float32),
            jax.ShapeDtypeStruct((B, Creg, HW), jnp.float32),
            jax.ShapeDtypeStruct((B, Cdir, HW), jnp.float32),
        ),
        grid_spec=pltpu.PrefetchScalarGridSpec(
            num_scalar_prefetch=0,
            grid=(n_blocks, B),
            in_specs=[x_spec, w_spec, b_spec],
            out_specs=[out_spec(Ccls), out_spec(Creg), out_spec(Cdir)],
        ),
        compiler_params=pltpu.CompilerParams(
            dimension_semantics=("parallel", "parallel"),
            vmem_limit_bytes=vmem_limit,
        ),
        cost_estimate=cost,
    )(x3, w_all, b_all)

    # Free reshapes back to NCHW.
    return (cls3.reshape(B, Ccls, H, W),
            reg3.reshape(B, Creg, H, W),
            dir3.reshape(B, Cdir, H, W))


def init_head_params(key, in_channel, n_anchors, n_classes):
    """Matches Head.__init__: normal(0, 0.01) weights; conv_cls bias = -log((1-p)/p).

    Weights stored as (Cout, Cin) — PyTorch's (Cout, Cin, 1, 1) conv weight squeezed.
    """
    c_cls = n_anchors * n_classes
    c_reg = n_anchors * 7
    c_dir = n_anchors * 2
    k1, k2, k3 = jax.random.split(key, 3)
    std = 0.01
    w_cls = std * jax.random.normal(k1, (c_cls, in_channel), jnp.float32)
    w_reg = std * jax.random.normal(k2, (c_reg, in_channel), jnp.float32)
    w_dir = std * jax.random.normal(k3, (c_dir, in_channel), jnp.float32)
    prior_prob = 0.01
    bias_init = float(-1 * math.log((1 - prior_prob) / prior_prob))
    b_cls = jnp.full((c_cls, 1), bias_init, jnp.float32)
    b_reg = jnp.zeros((c_reg, 1), jnp.float32)
    b_dir = jnp.zeros((c_dir, 1), jnp.float32)
    return (w_cls, b_cls, w_reg, b_reg, w_dir, b_dir)


def head_reference(x_nchw, params):
    """Pure-JAX reference (1x1 conv == einsum over channel dim)."""
    w_cls, b_cls, w_reg, b_reg, w_dir, b_dir = params

    def conv1x1(x, w, b):
        return jnp.einsum('bchw,oc->bohw', x, w) + b.reshape(1, -1, 1, 1)

    return (conv1x1(x_nchw, w_cls, b_cls),
            conv1x1(x_nchw, w_reg, b_reg),
            conv1x1(x_nchw, w_dir, b_dir))


if __name__ == "__main__":
    # Small synthetic shapes (module default is (bs, 384, 248, 216)).
    B, Cin, H, W = 2, 32, 16, 16
    n_anchors, n_classes = 2, 3

    key = jax.random.PRNGKey(0)
    k_x, k_p = jax.random.split(key)
    x = jax.random.normal(k_x, (B, Cin, H, W), jnp.float32)
    params = init_head_params(k_p, Cin, n_anchors, n_classes)

    cls_p, reg_p, dir_p = head_forward(x, params)
    jax.block_until_ready((cls_p, reg_p, dir_p))

    # Sanity-check against pure-JAX reference.
    cls_r, reg_r, dir_r = head_reference(x, params)
    assert cls_p.shape == (B, n_anchors * n_classes, H, W)
    assert reg_p.shape == (B, n_anchors * 7, H, W)
    assert dir_p.shape == (B, n_anchors * 2, H, W)
    assert jnp.allclose(cls_p, cls_r, atol=1e-5)
    assert jnp.allclose(reg_p, reg_r, atol=1e-5)
    assert jnp.allclose(dir_p, dir_r, atol=1e-5)

    print("KERNEL_OK")
</pallas_src>

<mosaic_0001>
module attributes {stable_mosaic.version = 11 : i64} {
  func.func @_head_kernel(%arg0: i32, %arg1: i32, %arg2: memref<1x32x256xf32, #tpu.memory_space<vmem>>, %arg3: memref<24x32xf32, #tpu.memory_space<vmem>>, %arg4: memref<24x1xf32, #tpu.memory_space<vmem>>, %arg5: memref<1x6x256xf32, #tpu.memory_space<vmem>>, %arg6: memref<1x14x256xf32, #tpu.memory_space<vmem>>, %arg7: memref<1x4x256xf32, #tpu.memory_space<vmem>>) attributes {dimension_semantics = [#tpu.dimension_semantics<parallel>, #tpu.dimension_semantics<parallel>], iteration_bounds = array<i64: 1, 2>, scalar_prefetch = 0 : i64, scratch_operands = 0 : i64, tpu.core_type = #tpu.core_type<tc>, window_params = [{transform_indices = @transform_0, window_bounds = array<i64: 1, 32, 256>}, {pipeline_mode = #tpu.pipeline_mode<synchronous>, transform_indices = @transform_1, window_bounds = array<i64: 24, 32>}, {pipeline_mode = #tpu.pipeline_mode<synchronous>, transform_indices = @transform_2, window_bounds = array<i64: 24, 1>}, {transform_indices = @transform_3, window_bounds = array<i64: 1, 6, 256>}, {transform_indices = @transform_4, window_bounds = array<i64: 1, 14, 256>}, {transform_indices = @transform_5, window_bounds = array<i64: 1, 4, 256>}]} {
    %c0 = arith.constant 0 : index
    %c0_0 = arith.constant 0 : index
    %0 = vector.load %arg3[%c0, %c0_0] : memref<24x32xf32, #tpu.memory_space<vmem>>, vector<24x32xf32>
    %c0_1 = arith.constant 0 : index
    %c0_2 = arith.constant 0 : index
    %c0_3 = arith.constant 0 : index
    %1 = vector.load %arg2[%c0_1, %c0_2, %c0_3] : memref<1x32x256xf32, #tpu.memory_space<vmem>>, vector<1x32x256xf32>
    %2 = vector.shape_cast %1 : vector<1x32x256xf32> to vector<32x256xf32>
    %cst = arith.constant dense<0.000000e+00> : vector<24x256xf32>
    %3 = tpu.matmul %0, %2, %cst {dimension_numbers = #tpu.dot_dimension_numbers<[1], [0], [0], [1], [0, 0, 1, 1], [], []>} : vector<24x32xf32>, vector<32x256xf32>, vector<24x256xf32> -> vector<24x256xf32>
    %c0_4 = arith.constant 0 : index
    %c0_5 = arith.constant 0 : index
    %4 = vector.load %arg4[%c0_4, %c0_5] : memref<24x1xf32, #tpu.memory_space<vmem>>, vector<24x1xf32>
    %5 = vector.broadcast %4 : vector<24x1xf32> to vector<24x256xf32>
    %6 = arith.addf %3, %5 : vector<24x256xf32>
    %7 = vector.extract_strided_slice %6 {offsets = [0, 0], sizes = [6, 256], strides = [1, 1]} : vector<24x256xf32> to vector<6x256xf32>
    %c0_6 = arith.constant 0 : index
    %c0_7 = arith.constant 0 : index
    %c0_8 = arith.constant 0 : index
    %8 = vector.load %arg5[%c0_6, %c0_7, %c0_8] : memref<1x6x256xf32, #tpu.memory_space<vmem>>, vector<1x6x256xf32>
    %9 = vector.shape_cast %8 : vector<1x6x256xf32> to vector<6x256xf32>
    %10 = vector.shape_cast %7 : vector<6x256xf32> to vector<1x6x256xf32>
    tpu.vector_store %arg5[%c0_6, %c0_7, %c0_8], %10 {strides = array<i32>} : memref<1x6x256xf32, #tpu.memory_space<vmem>>, vector<1x6x256xf32>,
    %11 = vector.extract_strided_slice %6 {offsets = [6, 0], sizes = [14, 256], strides = [1, 1]} : vector<24x256xf32> to vector<14x256xf32>
    %c0_9 = arith.constant 0 : index
    %c0_10 = arith.constant 0 : index
    %c0_11 = arith.constant 0 : index
    %12 = vector.load %arg6[%c0_9, %c0_10, %c0_11] : memref<1x14x256xf32, #tpu.memory_space<vmem>>, vector<1x14x256xf32>
    %13 = vector.shape_cast %12 : vector<1x14x256xf32> to vector<14x256xf32>
    %14 = vector.shape_cast %11 : vector<14x256xf32> to vector<1x14x256xf32>
    tpu.vector_store %arg6[%c0_9, %c0_10, %c0_11], %14 {strides = array<i32>} : memref<1x14x256xf32, #tpu.memory_space<vmem>>, vector<1x14x256xf32>,
    %15 = vector.extract_strided_slice %6 {offsets = [20, 0], sizes = [4, 256], strides = [1, 1]} : vector<24x256xf32> to vector<4x256xf32>
    %c0_12 = arith.constant 0 : index
    %c0_13 = arith.constant 0 : index
    %c0_14 = arith.constant 0 : index
    %16 = vector.load %arg7[%c0_12, %c0_13, %c0_14] : memref<1x4x256xf32, #tpu.memory_space<vmem>>, vector<1x4x256xf32>
    %17 = vector.shape_cast %16 : vector<1x4x256xf32> to vector<4x256xf32>
    %18 = vector.shape_cast %15 : vector<4x256xf32> to vector<1x4x256xf32>
    tpu.vector_store %arg7[%c0_12, %c0_13, %c0_14], %18 {strides = array<i32>} : memref<1x4x256xf32, #tpu.memory_space<vmem>>, vector<1x4x256xf32>,
    return
  }
  func.func @transform_0(%arg0: i32, %arg1: i32) -> (i32, i32, i32) {
    %c0_i32 = arith.constant 0 : i32
    %c0_i32_0 = arith.constant 0 : i32
    return %arg1, %c0_i32, %arg0 : i32, i32, i32
  }
  func.func @transform_1(%arg0: i32, %arg1: i32) -> (i32, i32) {
    %c0_i32 = arith.constant 0 : i32
    %c0_i32_0 = arith.constant 0 : i32
    %c0_i32_1 = arith.constant 0 : i32
    return %c0_i32, %c0_i32_0 : i32, i32
  }
  func.func @transform_2(%arg0: i32, %arg1: i32) -> (i32, i32) {
    %c0_i32 = arith.constant 0 : i32
    %c0_i32_0 = arith.constant 0 : i32
    %c0_i32_1 = arith.constant 0 : i32
    return %c0_i32, %c0_i32_0 : i32, i32
  }
  func.func @transform_3(%arg0: i32, %arg1: i32) -> (i32, i32, i32) {
    %c0_i32 = arith.constant 0 : i32
    %c0_i32_0 = arith.constant 0 : i32
    return %arg1, %c0_i32, %arg0 : i32, i32, i32
  }
  func.func @transform_4(%arg0: i32, %arg1: i32) -> (i32, i32, i32) {
    %c0_i32 = arith.constant 0 : i32
    %c0_i32_0 = arith.constant 0 : i32
    return %arg1, %c0_i32, %arg0 : i32, i32, i32
  }
  func.func @transform_5(%arg0: i32, %arg1: i32) -> (i32, i32, i32) {
    %c0_i32 = arith.constant 0 : i32
    %c0_i32_0 = arith.constant 0 : i32
    return %arg1, %c0_i32, %arg0 : i32, i32, i32
  }
}

</mosaic_0001>

<bundles_post_ra>
// kernel: tpu_custom_call.1
= control target key start
LH: loop header
LB: loop body
LE: loop exit
PB: predicated region body
PF: predicated region fallthrough
CT: control target
= control target key end

     0   :  { %11 = vsyncpa [#allocation3], 0  ;;  %s1123_s0 = inlined_call_operand.hbm [shape: f32[2,32,256], index: 0, kind: input, shape index: {}]   ;;  %s1124_s1 = inlined_call_operand.vmem [shape: f32[24,32], index: 1, kind: input, shape index: {}]   ;;  %s1125_s2 = inlined_call_operand.vmem [shape: f32[24,1], index: 2, kind: input, shape index: {}]   ;;  %s1126_s3 = inlined_call_operand.vmem [shape: f32[2,6,256], index: 3, kind: output, shape index: {0}]   ;;  %s1127_s4 = inlined_call_operand.vmem [shape: f32[2,14,256], index: 4, kind: output, shape index: {1}]   ;;  %s1128_s5 = inlined_call_operand.hbm [shape: f32[2,4,256], index: 5, kind: output, shape index: {2}]  }
   0x1   :  { %13 = vsyncpa [#allocation3 + $0x1], 0 }
   0x2   :  { %14 = vsyncpa [#allocation4], 0 }
   0x3   :  { %16 = vsyncpa [#allocation4 + $0x1], 0  ;;  %s919_s18 = smov 0   ;;  %s921_s19 = smov 0  }
   0x4   :  { %s923_s20 = smov 0   ;;  %s925_s21 = smov 0  }
   0x5   :  { %s927_s22 = smov 0   ;;  %s929_s23 = smov 0  }
   0x6 LB: > { %s663_s24 = sadd.s32 4294967295, %s881_s23   ;;  %s664_s25 = sadd.s32 4294967294, %s881_s23   ;;  %s881_s23 = sphi %s929_s23, %s22_s23   ;;  %s877_s22 = sphi %s927_s22, %s1143_s22   ;;  %s873_s21 = sphi %s925_s21, %s1142_s21   ;;  %s869_s20 = sphi %s923_s20, %s1141_s20   ;;  %s865_s19 = sphi %s921_s19, %s1140_s19   ;;  %s861_s18 = sphi %s919_s18, %s1139_s18  }
   0x7   : > { %s31_s26 = sadd.s32 1, %s877_s22  ;;  %s43_s27 = sadd.s32 1, %s869_s20 }
   0x8   : > { %p32_p0 = scmp.ge.s32.totalorder %s31_s26, 2  ;;  %p50_p1 = scmp.ne.s32.totalorder %s869_s20, %s865_s19 }
   0x9   : > { %p51_p2 = scmp.eq.s32.totalorder %s881_s23, 0  ;;  %p56_p3 = scmp.ne.s32.totalorder %s865_s19, %s861_s18 }
   0xa   : > { %s1145_s26 = smov (%p32_p0, %s31_s26), 0  ;;  %p57_p5 = scmp.eq.s32.totalorder %s663_s24, 0 }
   0xb   : > { %p960_p4 = por %p51_p2, %p50_p1  ;;  %s38_s29 = ssub.s32 %s877_s22, %s1145_s26 }
   0xc   : > { %p180_p6 = scmp.eq.s32.totalorder %s663_s24, 1  ;;  %p41_p7 = scmp.eq.s32.totalorder %s38_s29, 0 }
   0xd   : > { %p966_p8 = por %p57_p5, %p56_p3  ;;  %p186_p10 = scmp.eq.s32.totalorder %s664_s25, 1 }
   0xe   : > { %p970_p9 = por %p180_p6, %p50_p1  ;;  %p713_p13 = scmp.lt.s32.totalorder %s881_s23, 2 }
   0xf   : > { %s975_s7 = scalar_select %p41_p7, %s869_s20, %s43_s27  }
  0x10   : > { %s1132_s6 = scalar_select %p970_p9, 1, 0 }
  0x11   : > { %p977_p11 = por %p186_p10, %p56_p3  ;;  %s212_s9 = sand.u32 1, %s869_s20  }
  0x12   : > { %s667_s10 = sshll.u32 %s212_s9, 6  ;;  %s685_s11 = sshll.u32 %s877_s22, 10 }
  0x13   : > { %s1133_s8 = scalar_select %p977_p11, 1, 0 }
  0x14   : > { %s988_s14 = scalar_lea.hbm %s1123_s0, %s685_s11  ;;  %s216_s15 = scalar_lea.vmem [#allocation2], %s667_s10 }
  0x15   : > { %s225_s16 = sshll.u32 %s216_s15, 4  ;;  %p994_p0 = pnand %p713_p13, %p960_p4  ;;  %s990_s16 = int_to_ptr.vmem [resolvable:$true] %s225_s16 }
  0x16   : > { %s999_s24 = scalar_lea.sflag [#allocation3], %s212_s9  ;;  %s769_s25 = scalar_lea.hbm %s988_s14, 1024 }
  0x17   : > { %p770_p2 = scmp.ne.s32.totalorder %s988_s14, %s769_s25  ;;  %p771_p3 = pneg %p994_p0 }
  0x18   : > { %s774_s28 = scalar_lea.hbm %s1123_s0, 2048  ;;  %p775_p4 = scmp.lt.u32.totalorder %s988_s14, %s1123_s0 }
  0x19   : > { %p772_p5 = pnand %p771_p3, %p770_p2  ;;  %p776_p7 = scmp.lt.u32.totalorder %s774_s28, %s769_s25 }
  0x1a   : > { %p778_p13 = scmp.lt.u32.totalorder %s769_s25, %s988_s14 }
  0x1b   : > { %p773_p6 = pneg %p772_p5  ;;  %p777_p10 = por %p776_p7, %p775_p4 }
  0x1d   : > { %p779_p12 = por %p778_p13, %p777_p10 }
  0x1f   : > { %p780_p1 = pnand %p779_p12, %p773_p6 }
  0x21   : > { %783 = shalt.err (!%p780_p1)
}
  0x22   : > { %s784_s9 = scalar_lea.vmem %s990_s16, 1024  ;;  %s883_s12 = smov [#allocation2]  }
  0x23   : > { %p785_p2 = scmp.ne.s32.totalorder %s990_s16, %s784_s9  ;;  %s789_s13 = sshll.u32 %s883_s12, 4  ;;  %s790_s13 = int_to_ptr.vmem [resolvable:$false] %s789_s13 }
  0x24   : > { %s791_s15 = scalar_lea.vmem %s790_s13, 2048  ;;  %p792_p9 = scmp.lt.s32.totalorder %s990_s16, %s790_s13 }
  0x25   : > { %p787_p5 = pnand %p785_p2, %p771_p3  ;;  %p793_p4 = scmp.lt.s32.totalorder %s791_s15, %s784_s9 }
  0x27   : > { %p788_p11 = pneg %p787_p5  ;;  %p794_p7 = por %p793_p4, %p792_p9 }
  0x29   : > { %p795_p10 = pnand %p794_p7, %p788_p11 }
  0x2b   : > { %798 = shalt.err (!%p795_p10)
}
  0x2c   : > { %s884_s25 = smov 256   ;;  %s885_s27 = smov 16  }
  0x2d   : > { %708 = dma.hbm_to_vmem [thread:$0]  (!%p994_p0), %s988_s14, 1024, %s990_s16, %s999_s24, %s884_s25, %s884_s25, %s885_s27  }
  0x2e   : > { %p233_p12 = scmp.lt.s32.totalorder %s881_s23, 3  ;;  %p1135_p1 = scmp.ge.s32.totalorder %s881_s23, 1 }
  0x30   : > { %p234_p3 = pnand %p1135_p1, %p233_p12 }
  0x31   : > { %s1031_s29 = sand.u32 (!%p234_p3), 1, %s865_s19  }
  0x32   : > { %237 = sbr.rel (%p234_p3) target bundleno = 305 (0x131), region = 32  ;;  %s671_s28 = sshll.u32 (!%p234_p3), %s1031_s29, 6 }
  0x33   : > { %s240_s10 = scalar_lea.sflag (!%p234_p3), [#allocation3], %s1031_s29  ;;  %s243_s11 = scalar_lea.vmem (!%p234_p3), [#allocation2], %s671_s28 }
  0x39   : > { %852 = dma.done.wait (%p966_p8), %s240_s10, 1024  }
  0x3a   : > { %854 = vsyncadd (%p966_p8), %s240_s10, 4294966272  ;;  %v886_v0 = vmov 0.0   ;;  %v887_v1 = vmov 0   ;;  %v314_v2 = vld [vmem:[%s243_s11 + $0x8] sm:$0xff]  ;;  %v316_v3 = vld [vmem:[%s243_s11 + $0x18] sm:$0xff]  ;;  %vm339_vm0 = vcmask 261120  }
  0x3b   : > { %413 = vmatprep.mubr.f32.mxu0 %v886_v0  ;;  %419 = vmatprep.mubr.f32.mxu1 %v886_v0  ;;  %v313_v4 = vld [vmem:[%s243_s11] sm:$0xff]  ;;  %v689_v5 = vpack.c.bf16 %v316_v3, %v314_v2  ;;  %v315_v6 = vld [vmem:[%s243_s11 + $0x10] sm:$0xff]  ;;  %v318_v7 = vld [vmem:[%s243_s11 + $0x28] sm:$0xff]  ;;  %p290_p8 = scmp.lt.s32.totalorder %s873_s21, 1  ;;  %s672_s30 = sshll.u32 %s1031_s29, 3  ;;  %vm440_vm1 = vcmask 1041408  }
  0x3c   : > { %767 = vset.pattern.permute.xlu0 %v887_v1  ;;  %768 = vset.pattern.permute.xlu1 %v887_v1  ;;  %v320_v8 = vld [vmem:[%s243_s11 + $0x38] sm:$0xff]  ;;  %v691_v9 = vpack.c.bf16 %v315_v6, %v313_v4  ;;  %v317_v11 = vld [vmem:[%s243_s11 + $0x20] sm:$0xff]  ;;  %v319_v12 = vld [vmem:[%s243_s11 + $0x30] sm:$0xff]  ;;  %s688_s15 = sshll.u32 %s873_s21, 7  ;;  %s287_s25 = scalar_lea.vmem [#allocation5], %s672_s30 }
  0x3d   : > { %v693_v10 = vpack.c.bf16 %v320_v8, %v318_v7  ;;  %690 = vmatprep.subr.bf16.mxu0 %v689_v5  ;;  %697 = vmatprep.subr.bf16.mxu1 %v689_v5  ;;  %v321_v13 = vld [vmem:[%s1125_s2] sm:$0xff]  ;;  %v695_v14 = vpack.c.bf16 %v319_v12, %v317_v11  ;;  %v323_v15 = vld [vmem:[%s1125_s2 + $0x10] sm:$0xff]  ;;  %v322_v16 = vld [vmem:[%s1125_s2 + $0x8] sm:$0xff]  ;;  %s291_s10 = scalar_select %p290_p8, %s873_s21, 1 }
  0x3e   : > { %692 = vmatpush1.bf16.msra.mxu0 %v691_v9  ;;  %699 = vmatpush1.bf16.msra.mxu1 %v691_v9  ;;  %v310_v17 = vld [vmem:[%s1124_s1] sm:$0xff]  ;;  %v311_v18 = vld [vmem:[%s1124_s1 + $0x8] sm:$0xff]  ;;  %v312_v19 = vld [vmem:[%s1124_s1 + $0x10] sm:$0xff]  ;;  %s505_s27 = sshll.u32 %s287_s25, 4  ;;  %s481_s21 = scalar_lea.sflag [#allocation4], %s1031_s29  ;;  %s1074_s27 = int_to_ptr.vmem [resolvable:$true] %s505_s27 }
  0x3f   : > { %694 = vmatprep.subr.bf16.mxu0 %v693_v10  ;;  %698 = vmatprep.subr.bf16.mxu1 %v693_v10  ;;  %s686_s11 = sshll.u32 %s291_s10, 4  ;;  %s687_s24 = sshll.u32 %s291_s10, 5 }
  0x40   : > { %326 = vperm.xlu0 %767, %v321_v13   ;;  %336 = vperm.xlu1 %768, %v323_v15   ;;  %s297_s17 = scalar_lea.vmem %s1126_s3, %s686_s11  ;;  %s307_s13 = scalar_lea.vmem %s1127_s4, %s687_s24 }
  0x41   : > { %s1072_s11 = scalar_lea.hbm %s1128_s5, %s688_s15  ;;  %s799_s30 = scalar_lea.vmem %s1074_s27, 128 }
  0x42   : > { %696 = vmatpush1.bf16.msra.mxu0 %v695_v14  ;;  %700 = vmatpush1.bf16.msra.mxu1 %v695_v14  ;;  %p800_p9 = scmp.ne.s32.totalorder %s1074_s27, %s799_s30  ;;  %p1136_p11 = scmp.ne.s32.totalorder %s1132_s6, 0 }
  0x43   : > { %s888_s14 = smov [#allocation5]  }
  0x44   : > { %331 = vperm.xlu0 %767, %v322_v16   ;;  %p801_p0 = pnand %p800_p9, %p1136_p11  ;;  %s803_s16 = sshll.u32 %s888_s14, 4  ;;  %s804_s16 = int_to_ptr.vmem [resolvable:$false] %s803_s16 }
  0x45   : > { %677 = vmatmul.mubr.msk.f32.vlgmr.msra.gmra.mrb[0].mxu0 %vm339_vm0, %v310_v17  ;;  %678 = vmatmul.mubr.msk.f32.vlgmr.msra.gmra.mrb[0].mxu1 %vm339_vm0, %v311_v18  ;;  %p806_p13 = scmp.lt.s32.totalorder %s1074_s27, %s804_s16 }
  0x46   : > { %425 = vmatprep.mubr.f32.mxu1 %v886_v0  ;;  %p802_p6 = pneg %p801_p0 }
  0x49   : > { %679 = vmatmul.mubr.msk.f32.gmra.mrb[2].mxu1 %vm339_vm0, %v312_v19 }
  0xbf   : > { %v327_v20 = vpop.permute.xlu0 %326  ;;  %v337_v30 = vpop.permute.xlu1 %336 }
  0xc3   : > { %v332_v21 = vpop.permute.xlu0 %331 }
 0x118   : > { %v415_v22 = vpop.f32.mrb[0].mxu0  ;;  %v421_v23 = vpop.f32.mrb[0].mxu1 }
 0x119   : > { %v416_v24 = vadd.f32 %v415_v22, %v327_v20  ;;  %v422_v25 = vadd.f32 %v421_v23, %v332_v21  ;;  %v417_v26 = vpop.f32.mrb[1].mxu0  ;;  %v423_v27 = vpop.f32.mrb[1].mxu1 }
 0x11a   : > { %v418_v28 = vadd.f32 %v417_v26, %v327_v20  ;;  %v424_v29 = vadd.f32 %v423_v27, %v332_v21 }
 0x11b   : > { %432 = vst [vmem:[%s297_s17] sm:$0x3f] %v416_v24  ;;  %v441_v31 = vrot.slane %v416_v24, 6  ;;  %v442_v32 = vrot.slane %v422_v25, 6 }
 0x11c   : > { %433 = vst [vmem:[%s297_s17 + $0x8] sm:$0x3f] %v418_v28  ;;  %v444_v33 = vrot.slane %v418_v28, 6  ;;  %v445_v34 = vrot.slane %v424_v29, 6  ;;  %v427_v35 = vpop.f32.mrb[2].mxu1  ;;  %s805_s17 = scalar_lea.vmem %s804_s16, 256 }
 0x11d   : > { %v443_v36 = vsel %vm440_vm1, %v441_v31, %v442_v32  ;;  %v428_v37 = vadd.f32 %v427_v35, %v337_v30  ;;  %v429_v38 = vpop.f32.mrb[3].mxu1  ;;  %p807_p2 = scmp.lt.s32.totalorder %s805_s17, %s799_s30 }
 0x11e   : > { %455 = vst [vmem:[%s307_s13] sm:$0xff] %v443_v36  ;;  %v446_v39 = vsel %vm440_vm1, %v444_v33, %v445_v34  ;;  %v430_v40 = vadd.f32 %v429_v38, %v337_v30 }
 0x11f   : > { %456 = vst [vmem:[%s307_s13 + $0x8] sm:$0xff] %v446_v39  ;;  %v447_v41 = vrot.slane %v428_v37, 6  ;;  %p808_p5 = por %p807_p2, %p806_p13 }
 0x120   : > { %v449_v42 = vrot.slane %v430_v40, 6  ;;  %v459_v43 = vcombine.high %v428_v37, %v430_v40 }
 0x121   : > { %v448_v44 = vsel %vm440_vm1, %v442_v32, %v447_v41  ;;  %p809_p4 = pnand %p808_p5, %p802_p6 }
 0x122   : > { %457 = vst [vmem:[%s307_s13 + $0x10] sm:$0x3f] %v448_v44  ;;  %v450_v45 = vsel %vm440_vm1, %v445_v34, %v449_v42  ;;  %461 = vst [vmem:[%s287_s25] sm:$0xff] %v459_v43 }
 0x123   : > { %458 = vst [vmem:[%s307_s13 + $0x18] sm:$0x3f] %v450_v45 }
 0x124   : > { %812 = shalt.err (!%p809_p4)
}
 0x125   : > { %s813_s29 = scalar_lea.hbm %s1072_s11, 128  ;;  %s817_s12 = scalar_lea.hbm %s1128_s5, 256 }
 0x126   : > { %p814_p7 = scmp.ne.s32.totalorder %s1072_s11, %s813_s29  ;;  %p818_p1 = scmp.lt.u32.totalorder %s1072_s11, %s1128_s5 }
 0x127   : > { %p819_p3 = scmp.lt.u32.totalorder %s817_s12, %s813_s29  ;;  %p821_p9 = scmp.lt.u32.totalorder %s813_s29, %s1072_s11 }
 0x128   : > { %p815_p10 = pnand %p814_p7, %p1136_p11 }
 0x129   : > { %p820_p8 = por %p819_p3, %p818_p1 }
 0x12a   : > { %p816_p12 = pneg %p815_p10 }
 0x12b   : > { %p822_p0 = por %p821_p9, %p820_p8 }
 0x12d   : > { %p823_p6 = pnand %p822_p0, %p816_p12 }
 0x12f   : > { %826 = shalt.err (!%p823_p6)
}
 0x130   : > { %703 = dma.vmem_to_hbm [thread:$0]  (%p1136_p11), %s1074_s27, 128, %s1072_s11, %s481_s21  }
 0x131 PF: > { %s541_s25 = sand.u32 1, %s861_s18   ;;  %p1137_p13 = scmp.ne.s32.totalorder %s1133_s8, 0 }
 0x132   : > { %p1138_p2 = scmp.ge.s32.totalorder %s881_s23, 2  ;;  %s542_s28 = scalar_lea.sflag [#allocation4], %s541_s25 }
 0x134   : > { %p710_p5 = pnand %p1138_p2, %p1137_p13 }
 0x136   : > { %856 = dma.done.wait (!%p710_p5), %s542_s28, 128  }
 0x137   : > { %858 = vsyncadd (!%p710_p5), %s542_s28, 4294967168  ;;  %s22_s23 = sadd.s32 1, %s881_s23   ;;  %s1139_s18 = smov %s865_s19 }
 0x138   : > { %p19_p4 = scmp.ge.s32.totalorder %s22_s23, 4   ;;  %s1140_s19 = smov %s869_s20 }
 0x139   : > { %s1141_s20 = smov %s975_s7  ;;  %s1142_s21 = smov %s877_s22 }
 0x13a   : > { %s1143_s22 = smov %s1145_s26  ;;  %21 = sbr.rel (!%p19_p4) target bundleno = 6 (0x6), region = 101 }
 0x141   :  { %547 = vsyncpa [#allocation3], 1 }
 0x142   :  { %549 = vsyncpa [#allocation3 + $0x1], 1 }
 0x143   :  { %550 = vsyncpa [#allocation4], 1 }
 0x144   :  { %552 = vsyncpa [#allocation4 + $0x1], 1 }

</bundles_post_ra>
